<compile_context>
chip_gen: v7x
topology: tpu7x:2x2x1
jax: 0.10.0
libtpu: 0.0.40
codegen_flags: <defaults>
</compile_context>

<pallas_src>
import functools

import jax
import jax.numpy as jnp
from jax import lax
from jax.experimental import pallas as pl
from jax.experimental.pallas import tpu as pltpu


def _round_up(x, m):
    return (x + m - 1) // m * m


def _cdiv(a, b):
    return (a + b - 1) // b


# ---------------------------------------------------------------------------
# Phase 0: normalization prologue + per-row diag + column sums.
# ---------------------------------------------------------------------------
def _normalize_kernel(h_ref, f_ref, hn_ref, fn_ref, diag_ref,
                      csum_h_ref, csum_f_ref, *, inv_temp):
    @pl.when(pl.program_id(0) == 0)
    def _init():
        csum_h_ref[...] = jnp.zeros_like(csum_h_ref)
        csum_f_ref[...] = jnp.zeros_like(csum_f_ref)

    h = h_ref[...].astype(jnp.float32)   # (T, D)
    f = f_ref[...].astype(jnp.float32)   # (T, D)

    # F.normalize(x, dim=-1): x / max(||x||, 1e-12) == x * rsqrt(max(||x||^2, 1e-24))
    hn = h * lax.rsqrt(jnp.maximum(jnp.sum(h * h, axis=-1, keepdims=True), 1e-24))
    # Fold 1/temperature into f so the phase-1 matmul emits sim/T directly.
    fn = f * (lax.rsqrt(jnp.maximum(jnp.sum(f * f, axis=-1, keepdims=True), 1e-24))
              * inv_temp)

    hn_ref[...] = hn.astype(hn_ref.dtype)
    fn_ref[...] = fn.astype(fn_ref.dtype)
    # Diagonal of sim/T, computed in f32 before any narrowing cast.
    diag_ref[...] = jnp.sum(hn * fn, axis=-1, keepdims=True)
    # Column sums (f32) -> total similarity is <csum_h, csum_f> in the epilogue.
    csum_h_ref[...] += jnp.sum(hn, axis=0, keepdims=True)
    csum_f_ref[...] += jnp.sum(fn, axis=0, keepdims=True)


# ---------------------------------------------------------------------------
# Phase 1: per-row softmax denominators over the (N, N) similarity matrix.
# ---------------------------------------------------------------------------
def _denom_kernel(hn_ref, fn_ref, denom_ref):
    @pl.when(pl.program_id(1) == 0)
    def _init():
        denom_ref[...] = jnp.zeros_like(denom_ref)

    # NT matmul on the MXU (contract the embedding axis of both operands,
    # no transposed copy of fn); operands stay in their native dtype.
    sim_s = lax.dot_general(
        hn_ref[...], fn_ref[...],
        dimension_numbers=(((1,), (1,)), ((), ())),
        preferred_element_type=jnp.float32)                 # (TM, TN) == sim / T

    # exp is consumed immediately by the row reduction (single live tile).
    denom_ref[...] += jnp.sum(jnp.exp(sim_s), axis=1, keepdims=True)


def info_nce_pallas(history, future, temperature=0.1, reduction="mean"):
    assert reduction in ("mean", "sum", "none")
    assert history.ndim == 2 and future.ndim == 2
    assert history.shape == future.shape

    N, D = history.shape
    in_dt = history.dtype
    # Feed the MXU operands in the caller's native dtype: bf16 callers get
    # bf16-native matmuls + halved DMA; f32 callers keep full precision.
    mxu_dt = jnp.bfloat16 if in_dt == jnp.bfloat16 else jnp.float32
    sub = 8 if in_dt.itemsize >= 4 else 16          # sublane granularity

    n_pad0 = _round_up(max(N, sub), sub)
    if n_pad0 <= sub:
        n_tiles, tile = 1, n_pad0
    else:
        # >=2 row tiles so the "parallel" axis shards across v7x's 2 TCs;
        # tiles capped at 512 to amortize the ~0.35us/step pipeline overhead.
        n_tiles = max(2, _cdiv(n_pad0, 512))
        tile = _round_up(_cdiv(n_pad0, n_tiles), sub)
    n_pad = n_tiles * tile
    d_pad = _round_up(D, 128)

    # Pad in the caller's native dtype (no wrapper upcast).
    h = history
    f = future
    if (n_pad, d_pad) != (N, D):
        h = jnp.pad(h, ((0, n_pad - N), (0, d_pad - D)))
        f = jnp.pad(f, ((0, n_pad - N), (0, d_pad - D)))

    inv_temp = float(1.0 / temperature)

    # --- Phase 0: normalize + diag + column sums (O(N*D)) -------------------
    norm_kernel = functools.partial(_normalize_kernel, inv_temp=inv_temp)
    hn, fn, diag, csum_h, csum_f = pl.pallas_call(
        norm_kernel,
        out_shape=(
            jax.ShapeDtypeStruct((n_pad, d_pad), mxu_dt),
            jax.ShapeDtypeStruct((n_pad, d_pad), mxu_dt),
            jax.ShapeDtypeStruct((n_pad, 1), jnp.float32),
            jax.ShapeDtypeStruct((1, d_pad), jnp.float32),
            jax.ShapeDtypeStruct((1, d_pad), jnp.float32),
        ),
        grid=(n_tiles,),
        in_specs=[
            pl.BlockSpec((tile, d_pad), lambda i: (i, 0)),
            pl.BlockSpec((tile, d_pad), lambda i: (i, 0)),
        ],
        out_specs=(
            pl.BlockSpec((tile, d_pad), lambda i: (i, 0)),
            pl.BlockSpec((tile, d_pad), lambda i: (i, 0)),
            pl.BlockSpec((tile, 1), lambda i: (i, 0)),
            pl.BlockSpec((1, d_pad), lambda i: (0, 0)),      # resident accumulator
            pl.BlockSpec((1, d_pad), lambda i: (0, 0)),      # resident accumulator
        ),
        compiler_params=pltpu.CompilerParams(
            dimension_semantics=("arbitrary",)),
    )(h, f)

    # --- Phase 1: row-wise exp-sum denominators (O(N^2 * D)) ----------------
    fn_spec_kwargs = {}
    if d_pad >= 512:
        # Deeper buffering on the only per-step streamed operand for large D.
        fn_spec_kwargs["pipeline_mode"] = pl.Buffered(3)
    denom = pl.pallas_call(
        _denom_kernel,
        out_shape=jax.ShapeDtypeStruct((n_pad, 1), jnp.float32),
        grid=(n_tiles, n_tiles),
        in_specs=[
            pl.BlockSpec((tile, d_pad), lambda i, j: (i, 0)),                 # hn rows
            pl.BlockSpec((tile, d_pad), lambda i, j: (j, 0), **fn_spec_kwargs),  # fn cols
        ],
        out_specs=pl.BlockSpec((tile, 1), lambda i, j: (i, 0)),
        compiler_params=pltpu.CompilerParams(
            dimension_semantics=("parallel", "arbitrary"),
            vmem_limit_bytes=48 * 1024 * 1024),   # > v5e 16MiB default, < v7x 64MiB
    )(hn, fn)

    # --- Epilogue: O(N) scalar math in plain jnp (single XLA fusion) --------
    valid = (jnp.arange(n_pad) < N)[:, None]
    denom = denom - float(n_pad - N)                 # padded columns: exp(0) == 1
    diag_s = diag                                    # sim_ii / T

    pos_sum = jnp.sum(jnp.where(valid, jnp.exp(diag_s), 0.0))
    x = pos_sum / denom                              # logits, (n_pad, 1)
    # binary_cross_entropy_with_logits, target = 1:
    #   max(x, 0) - x + log1p(exp(-|x|))
    bce = jnp.maximum(x, 0.0) - x + jnp.log1p(jnp.exp(-jnp.abs(x)))
    bce = jnp.where(valid, bce, 0.0)
    if reduction == "mean":
        loss = jnp.sum(bce) / N
    elif reduction == "sum":
        loss = jnp.sum(bce)
    else:  # 'none'
        loss = bce[:N, 0]

    diag_sum = jnp.sum(jnp.where(valid, diag_s, 0.0)) * temperature   # sum_i sim_ii
    total_sum = jnp.sum(csum_h * csum_f) * temperature                # sum_ij sim_ij
    mean_sim = diag_sum / N
    mean_neg = (total_sum - diag_sum) / (N * (N - 1))
    return loss, mean_sim, mean_neg


def _info_nce_ref(history, future, temperature=0.1):
    # Pure-JAX reference mirroring the PyTorch semantics (for sanity check).
    history = history.astype(jnp.float32)
    future = future.astype(jnp.float32)
    hn = history / jnp.maximum(
        jnp.linalg.norm(history, axis=-1, keepdims=True), 1e-12)
    fn = future / jnp.maximum(
        jnp.linalg.norm(future, axis=-1, keepdims=True), 1e-12)
    sim = hn @ fn.T
    N = sim.shape[0]
    all_sim = jnp.exp(sim / temperature)
    diag = jnp.diagonal(sim)
    pos_sum = jnp.sum(jnp.exp(diag / temperature))
    logits = pos_sum / jnp.sum(all_sim, axis=1)
    bce = jnp.maximum(logits, 0.0) - logits + jnp.log1p(jnp.exp(-jnp.abs(logits)))
    loss = jnp.mean(bce)
    mean_sim = jnp.mean(diag)
    off = jnp.where(jnp.eye(N, dtype=bool), 0.0, sim)
    mean_neg = jnp.sum(off) / (N * (N - 1))
    return loss, mean_sim, mean_neg


if __name__ == "__main__":
    import numpy as np

    # InfoNCE has no learnable parameters; only temperature/reduction.
    key = jax.random.PRNGKey(0)
    k1, k2, k3, k4 = jax.random.split(key, 4)

    # Case 1: small single-tile path (module-consistent shape).
    N, D = 8, 32
    history = jax.random.normal(k1, (N, D), dtype=jnp.float32)
    future = jax.random.normal(k2, (N, D), dtype=jnp.float32)
    loss, mean_sim, mean_neg = info_nce_pallas(history, future, temperature=0.1)
    jax.block_until_ready((loss, mean_sim, mean_neg))
    ref = _info_nce_ref(history, future, temperature=0.1)
    assert np.allclose(np.asarray(loss), np.asarray(ref[0]), rtol=1e-4, atol=1e-5)
    assert np.allclose(np.asarray(mean_sim), np.asarray(ref[1]), rtol=1e-4, atol=1e-5)
    assert np.allclose(np.asarray(mean_neg), np.asarray(ref[2]), rtol=1e-4, atol=1e-5)

    # Case 2: multi-tile + row/column-padding path (2x2 grid, f32 MXU path).
    N2, D2 = 300, 40
    h2 = jax.random.normal(k3, (N2, D2), dtype=jnp.float32)
    f2 = jax.random.normal(k4, (N2, D2), dtype=jnp.float32)
    out2 = info_nce_pallas(h2, f2, temperature=0.1)
    jax.block_until_ready(out2)
    ref2 = _info_nce_ref(h2, f2, temperature=0.1)
    for got, want in zip(out2, ref2):
        assert np.allclose(np.asarray(got), np.asarray(want), rtol=1e-4, atol=1e-5)

    # Case 3: bf16 inputs -> bf16 MXU operands (smoke test: finite outputs;
    # bf16 operand quantization makes tight tolerances inappropriate here).
    h3 = h2.astype(jnp.bfloat16)
    f3 = f2.astype(jnp.bfloat16)
    out3 = info_nce_pallas(h3, f3, temperature=0.1)
    jax.block_until_ready(out3)
    assert all(np.isfinite(np.asarray(o, dtype=np.float32)).all() for o in out3)

    print("KERNEL_OK")
</pallas_src>

<mosaic_0001>
module attributes {stable_mosaic.version = 11 : i64} {
  func.func @_normalize_kernel(%arg0: i32, %arg1: memref<8x128xf32, #tpu.memory_space<vmem>>, %arg2: memref<8x128xf32, #tpu.memory_space<vmem>>, %arg3: memref<8x128xf32, #tpu.memory_space<vmem>>, %arg4: memref<8x128xf32, #tpu.memory_space<vmem>>, %arg5: memref<8x1xf32, #tpu.memory_space<vmem>>, %arg6: memref<1x128xf32, #tpu.memory_space<vmem>>, %arg7: memref<1x128xf32, #tpu.memory_space<vmem>>) attributes {dimension_semantics = [#tpu.dimension_semantics<arbitrary>], iteration_bounds = array<i64: 1>, scalar_prefetch = 0 : i64, scratch_operands = 0 : i64, tpu.core_type = #tpu.core_type<tc>, window_params = [{transform_indices = @transform_0, window_bounds = array<i64: 8, 128>}, {transform_indices = @transform_1, window_bounds = array<i64: 8, 128>}, {transform_indices = @transform_2, window_bounds = array<i64: 8, 128>}, {transform_indices = @transform_3, window_bounds = array<i64: 8, 128>}, {transform_indices = @transform_4, window_bounds = array<i64: 8, 1>}, {pipeline_mode = #tpu.pipeline_mode<synchronous>, transform_indices = @transform_5, window_bounds = array<i64: 1, 128>}, {pipeline_mode = #tpu.pipeline_mode<synchronous>, transform_indices = @transform_6, window_bounds = array<i64: 1, 128>}]} {
    %c0_i32 = arith.constant 0 : i32
    %0 = arith.cmpi eq, %arg0, %c0_i32 : i32
    %1 = arith.extui %0 : i1 to i32
    %c0_i32_0 = arith.constant 0 : i32
    %2 = arith.cmpi ne, %1, %c0_i32_0 : i32
    scf.if %2 {
      %cst_25 = arith.constant 0.000000e+00 : f32
      %39 = vector.broadcast %cst_25 : f32 to vector<1x128xf32>
      %c0_26 = arith.constant 0 : index
      %c0_27 = arith.constant 0 : index
      %40 = vector.load %arg6[%c0_26, %c0_27] : memref<1x128xf32, #tpu.memory_space<vmem>>, vector<1x128xf32>
      tpu.vector_store %arg6[%c0_26, %c0_27], %39 {strides = array<i32>} : memref<1x128xf32, #tpu.memory_space<vmem>>, vector<1x128xf32>,
      %cst_28 = arith.constant 0.000000e+00 : f32
      %41 = vector.broadcast %cst_28 : f32 to vector<1x128xf32>
      %c0_29 = arith.constant 0 : index
      %c0_30 = arith.constant 0 : index
      %42 = vector.load %arg7[%c0_29, %c0_30] : memref<1x128xf32, #tpu.memory_space<vmem>>, vector<1x128xf32>
      tpu.vector_store %arg7[%c0_29, %c0_30], %41 {strides = array<i32>} : memref<1x128xf32, #tpu.memory_space<vmem>>, vector<1x128xf32>,
    } else {
    }
    %c0 = arith.constant 0 : index
    %c0_1 = arith.constant 0 : index
    %3 = vector.load %arg1[%c0, %c0_1] : memref<8x128xf32, #tpu.memory_space<vmem>>, vector<8x128xf32>
    %c0_2 = arith.constant 0 : index
    %c0_3 = arith.constant 0 : index
    %4 = vector.load %arg2[%c0_2, %c0_3] : memref<8x128xf32, #tpu.memory_space<vmem>>, vector<8x128xf32>
    %5 = arith.mulf %3, %3 : vector<8x128xf32>
    %cst = arith.constant dense<0.000000e+00> : vector<8xf32>
    %6 = vector.multi_reduction <add>, %5, %cst [1] : vector<8x128xf32> to vector<8xf32>
    %7 = vector.shape_cast %6 : vector<8xf32> to vector<8x1xf32>
    %cst_4 = arith.constant 1.000000e-24 : f32
    %8 = vector.broadcast %cst_4 : f32 to vector<8x1xf32>
    %9 = arith.maximumf %7, %8 : vector<8x1xf32>
    %10 = math.rsqrt %9 : vector<8x1xf32>
    %11 = vector.broadcast %10 : vector<8x1xf32> to vector<8x128xf32>
    %12 = arith.mulf %3, %11 : vector<8x128xf32>
    %13 = arith.mulf %4, %4 : vector<8x128xf32>
    %cst_5 = arith.constant dense<0.000000e+00> : vector<8xf32>
    %14 = vector.multi_reduction <add>, %13, %cst_5 [1] : vector<8x128xf32> to vector<8xf32>
    %15 = vector.shape_cast %14 : vector<8xf32> to vector<8x1xf32>
    %cst_6 = arith.constant 1.000000e-24 : f32
    %16 = vector.broadcast %cst_6 : f32 to vector<8x1xf32>
    %17 = arith.maximumf %15, %16 : vector<8x1xf32>
    %18 = math.rsqrt %17 : vector<8x1xf32>
    %cst_7 = arith.constant 1.000000e+01 : f32
    %19 = vector.broadcast %cst_7 : f32 to vector<8x1xf32>
    %20 = arith.mulf %18, %19 : vector<8x1xf32>
    %21 = vector.broadcast %20 : vector<8x1xf32> to vector<8x128xf32>
    %22 = arith.mulf %4, %21 : vector<8x128xf32>
    %c0_8 = arith.constant 0 : index
    %c0_9 = arith.constant 0 : index
    %23 = vector.load %arg3[%c0_8, %c0_9] : memref<8x128xf32, #tpu.memory_space<vmem>>, vector<8x128xf32>
    tpu.vector_store %arg3[%c0_8, %c0_9], %12 {strides = array<i32>} : memref<8x128xf32, #tpu.memory_space<vmem>>, vector<8x128xf32>,
    %c0_10 = arith.constant 0 : index
    %c0_11 = arith.constant 0 : index
    %24 = vector.load %arg4[%c0_10, %c0_11] : memref<8x128xf32, #tpu.memory_space<vmem>>, vector<8x128xf32>
    tpu.vector_store %arg4[%c0_10, %c0_11], %22 {strides = array<i32>} : memref<8x128xf32, #tpu.memory_space<vmem>>, vector<8x128xf32>,
    %25 = arith.mulf %12, %22 : vector<8x128xf32>
    %cst_12 = arith.constant dense<0.000000e+00> : vector<8xf32>
    %26 = vector.multi_reduction <add>, %25, %cst_12 [1] : vector<8x128xf32> to vector<8xf32>
    %27 = vector.shape_cast %26 : vector<8xf32> to vector<8x1xf32>
    %c0_13 = arith.constant 0 : index
    %c0_14 = arith.constant 0 : index
    %28 = vector.load %arg5[%c0_13, %c0_14] : memref<8x1xf32, #tpu.memory_space<vmem>>, vector<8x1xf32>
    tpu.vector_store %arg5[%c0_13, %c0_14], %27 {strides = array<i32>} : memref<8x1xf32, #tpu.memory_space<vmem>>, vector<8x1xf32>,
    %c0_15 = arith.constant 0 : index
    %c0_16 = arith.constant 0 : index
    %29 = vector.load %arg6[%c0_15, %c0_16] : memref<1x128xf32, #tpu.memory_space<vmem>>, vector<1x128xf32>
    %cst_17 = arith.constant dense<0.000000e+00> : vector<128xf32>
    %30 = vector.multi_reduction <add>, %12, %cst_17 [0] : vector<8x128xf32> to vector<128xf32>
    %31 = vector.shape_cast %30 : vector<128xf32> to vector<1x128xf32>
    %32 = arith.addf %29, %31 : vector<1x128xf32>
    %c0_18 = arith.constant 0 : index
    %c0_19 = arith.constant 0 : index
    %33 = vector.load %arg6[%c0_18, %c0_19] : memref<1x128xf32, #tpu.memory_space<vmem>>, vector<1x128xf32>
    tpu.vector_store %arg6[%c0_18, %c0_19], %32 {strides = array<i32>} : memref<1x128xf32, #tpu.memory_space<vmem>>, vector<1x128xf32>,
    %c0_20 = arith.constant 0 : index
    %c0_21 = arith.constant 0 : index
    %34 = vector.load %arg7[%c0_20, %c0_21] : memref<1x128xf32, #tpu.memory_space<vmem>>, vector<1x128xf32>
    %cst_22 = arith.constant dense<0.000000e+00> : vector<128xf32>
    %35 = vector.multi_reduction <add>, %22, %cst_22 [0] : vector<8x128xf32> to vector<128xf32>
    %36 = vector.shape_cast %35 : vector<128xf32> to vector<1x128xf32>
    %37 = arith.addf %34, %36 : vector<1x128xf32>
    %c0_23 = arith.constant 0 : index
    %c0_24 = arith.constant 0 : index
    %38 = vector.load %arg7[%c0_23, %c0_24] : memref<1x128xf32, #tpu.memory_space<vmem>>, vector<1x128xf32>
    tpu.vector_store %arg7[%c0_23, %c0_24], %37 {strides = array<i32>} : memref<1x128xf32, #tpu.memory_space<vmem>>, vector<1x128xf32>,
    return
  }
  func.func @transform_0(%arg0: i32) -> (i32, i32) {
    %c0_i32 = arith.constant 0 : i32
    %c0_i32_0 = arith.constant 0 : i32
    return %arg0, %c0_i32 : i32, i32
  }
  func.func @transform_1(%arg0: i32) -> (i32, i32) {
    %c0_i32 = arith.constant 0 : i32
    %c0_i32_0 = arith.constant 0 : i32
    return %arg0, %c0_i32 : i32, i32
  }
  func.func @transform_2(%arg0: i32) -> (i32, i32) {
    %c0_i32 = arith.constant 0 : i32
    %c0_i32_0 = arith.constant 0 : i32
    return %arg0, %c0_i32 : i32, i32
  }
  func.func @transform_3(%arg0: i32) -> (i32, i32) {
    %c0_i32 = arith.constant 0 : i32
    %c0_i32_0 = arith.constant 0 : i32
    return %arg0, %c0_i32 : i32, i32
  }
  func.func @transform_4(%arg0: i32) -> (i32, i32) {
    %c0_i32 = arith.constant 0 : i32
    %c0_i32_0 = arith.constant 0 : i32
    return %arg0, %c0_i32 : i32, i32
  }
  func.func @transform_5(%arg0: i32) -> (i32, i32) {
    %c0_i32 = arith.constant 0 : i32
    %c0_i32_0 = arith.constant 0 : i32
    %c0_i32_1 = arith.constant 0 : i32
    return %c0_i32, %c0_i32_0 : i32, i32
  }
  func.func @transform_6(%arg0: i32) -> (i32, i32) {
    %c0_i32 = arith.constant 0 : i32
    %c0_i32_0 = arith.constant 0 : i32
    %c0_i32_1 = arith.constant 0 : i32
    return %c0_i32, %c0_i32_0 : i32, i32
  }
}

</mosaic_0001>

<bundles_post_ra>
// kernel: tpu_custom_call.1
= control target key start
LH: loop header
LB: loop body
LE: loop exit
PB: predicated region body
PF: predicated region fallthrough
CT: control target
= control target key end

     0   :  { %12 = vsyncpa [#allocation3], 0  ;;  %s420_s0 = inlined_call_operand.hbm [shape: f32[8,128], index: 0, kind: input, shape index: {}]   ;;  %s421_s1 = inlined_call_operand.hbm [shape: f32[8,128], index: 1, kind: input, shape index: {}]   ;;  %s422_s2 = inlined_call_operand.hbm [shape: f32[8,128], index: 2, kind: output, shape index: {0}]   ;;  %s423_s3 = inlined_call_operand.hbm [shape: f32[8,128], index: 3, kind: output, shape index: {1}]   ;;  %s424_s4 = inlined_call_operand.vmem [shape: f32[8,1], index: 4, kind: output, shape index: {2}]   ;;  %s425_s5 = inlined_call_operand.hbm [shape: f32[1,128], index: 5, kind: output, shape index: {3}]   ;;  %s426_s6 = inlined_call_operand.hbm [shape: f32[1,128], index: 6, kind: output, shape index: {4}]  }
   0x1   :  { %13 = vsyncpa [#allocation6], 0 }
   0x2   :  { %14 = vsyncpa [#allocation4], 0 }
   0x3   :  { %15 = vsyncpa [#allocation9], 0 }
   0x4   :  { %16 = vsyncpa [#allocation12], 0  ;;  %s303_s21 = smov [#allocation2]   ;;  %s304_s23 = smov [#allocation5]  }
   0x5   :  { %s23_s22 = sshll.u32 %s303_s21, 4  ;;  %s33_s24 = sshll.u32 %s304_s23, 4  ;;  %s24_s22 = int_to_ptr.vmem [resolvable:$true] %s23_s22  ;;  %s34_s24 = int_to_ptr.vmem [resolvable:$true] %s33_s24 }
   0x6   :  { %s161_s27 = scalar_lea.hbm %s420_s0, 128 }
   0x7   :  { %p162_p0 = scmp.ne.s32.totalorder %s420_s0, %s161_s27  ;;  %p165_p1 = scmp.lt.u32.totalorder %s161_s27, %s420_s0 }
   0x9   :  { %p167_p2 = pnand %p165_p1, %p162_p0 }
   0xb   :  { %170 = shalt.err (!%p167_p2)
}
   0xc   :  { %s171_s8 = scalar_lea.vmem %s24_s22, 128  ;;  %p176_p4 = scmp.lt.s32.totalorder %s24_s22, %s24_s22 }
   0xd   :  { %p172_p3 = scmp.ne.s32.totalorder %s24_s22, %s171_s8  ;;  %p177_p5 = scmp.lt.s32.totalorder %s171_s8, %s171_s8 }
   0xf   :  { %p178_p6 = por %p177_p5, %p176_p4 }
  0x11   :  { %p179_p7 = pnand %p178_p6, %p172_p3 }
  0x13   :  { %182 = shalt.err (!%p179_p7)
}
  0x14   :  { %26 = dma.hbm_to_vmem [thread:$0]  %s420_s0, 128, %s24_s22, [#allocation3]  }
  0x15   :  { %s183_s13 = scalar_lea.hbm %s421_s1, 128 }
  0x16   :  { %p184_p8 = scmp.ne.s32.totalorder %s421_s1, %s183_s13  ;;  %p187_p9 = scmp.lt.u32.totalorder %s183_s13, %s421_s1 }
  0x18   :  { %p189_p10 = pnand %p187_p9, %p184_p8 }
  0x1a   :  { %192 = shalt.err (!%p189_p10)
}
  0x1b   :  { %s193_s18 = scalar_lea.vmem %s34_s24, 128  ;;  %p198_p12 = scmp.lt.s32.totalorder %s34_s24, %s34_s24 }
  0x1c   :  { %p194_p11 = scmp.ne.s32.totalorder %s34_s24, %s193_s18  ;;  %p199_p13 = scmp.lt.s32.totalorder %s193_s18, %s193_s18 }
  0x1e   :  { %p200_p0 = por %p199_p13, %p198_p12 }
  0x20   :  { %p201_p1 = pnand %p200_p0, %p194_p11 }
  0x22   :  { %204 = shalt.err (!%p201_p1)
}
  0x23   :  { %36 = dma.hbm_to_vmem [thread:$0]  %s421_s1, 128, %s34_s24, [#allocation6]  }
  0x24   :  { %293 = dma.done.wait [#allocation3], 128  }
  0x25   :  { %294 = vsyncadd [#allocation3], 4294967168 }
  0x26   :  { %295 = dma.done.wait [#allocation6], 128  }
  0x27   :  { %296 = vsyncadd [#allocation6], 4294967168  ;;  %v50_v0 = vld [vmem:[#allocation5] sm:$0xff]  ;;  %v49_v1 = vld [vmem:[#allocation2] sm:$0xff]  ;;  %v305_v4 = vmov 0.0   ;;  %s306_s1 = smov [#allocation8]  }
  0x28   :  { %v57_v2 = vmul.f32 %v50_v0, %v50_v0  ;;  %v51_v3 = vmul.f32 %v49_v1, %v49_v1  ;;  %47 = vst [vmem:[#allocation10] sm:$0x1] %v305_v4  ;;  %48 = vst [vmem:[#allocation11] sm:$0x1] %v305_v4  ;;  %s105_s20 = sshll.u32 %s306_s1, 4  ;;  %s106_s20 = int_to_ptr.vmem [resolvable:$true] %s105_s20 }
  0x29   :  { %s205_s21 = scalar_lea.vmem %s106_s20, 128  ;;  %p210_p3 = scmp.lt.s32.totalorder %s106_s20, %s106_s20 }
  0x2a   :  { %58 = vadd.xlane.f32.xlu0 %v57_v2  ;;  %p206_p2 = scmp.ne.s32.totalorder %s106_s20, %s205_s21  ;;  %p211_p4 = scmp.lt.s32.totalorder %s205_s21, %s205_s21 }
  0x2c   :  { %p212_p5 = por %p211_p4, %p210_p3 }
  0x2e   :  { %52 = vadd.xlane.f32.xlu0 %v51_v3  ;;  %p213_p6 = pnand %p212_p5, %p206_p2 }
  0xb7   :  { %v59_v5 = vpop.xlane.xlu0 %58 }
  0xb8   :  { %v60_v6 = vmax.f32 %v59_v5, 1e-24 }
  0xba   :  { %157 = vrsqrt.f32 %v60_v6 }
  0xbb   :  { %v53_v7 = vpop.xlane.xlu0 %52 }
  0xbc   :  { %v54_v8 = vmax.f32 %v53_v7, 1e-24 }
  0xbe   :  { %159 = vrsqrt.f32 %v54_v8 }
  0xc4   :  { %v158_v9 = vpop.eup %157 }
  0xc5   :  { %v62_v10 = vmul.f32 10.0, %v158_v9 }
  0xc7   :  { %v63_v11 = vmul.f32 %v62_v10, %v50_v0 }
  0xc8   :  { %v160_v12 = vpop.eup %159 }
  0xc9   :  { %v81_v13 = vrot.slane %v63_v11, 4  ;;  %65 = vst [vmem:[#allocation8] sm:$0xff] %v63_v11  ;;  %v56_v14 = vmul.f32 %v160_v12, %v49_v1 }
  0xca   :  { %216 = shalt.err (!%p213_p6)
}
  0xcb   :  { %s217_s24 = scalar_lea.hbm %s423_s3, 128 }
  0xcc   :  { %p218_p7 = scmp.ne.s32.totalorder %s423_s3, %s217_s24  ;;  %p221_p8 = scmp.lt.u32.totalorder %s217_s24, %s423_s3 }
  0xce   :  { %p223_p9 = pnand %p221_p8, %p218_p7 }
  0xd0   :  { %226 = shalt.err (!%p223_p9)
}
  0xd1   :  { %108 = dma.vmem_to_hbm [thread:$0]  %s106_s20, 128, %s423_s3, [#allocation9]   ;;  %v66_v15 = vmul.f32 %v63_v11, %v56_v14  ;;  %v72_v16 = vrot.slane %v56_v14, 4  ;;  %64 = vst [vmem:[#allocation7] sm:$0xff] %v56_v14  ;;  %v82_v17 = vadd.f32 %v81_v13, %v63_v11  ;;  %v80_v24 = vld [vmem:[#allocation11] sm:$0x1] }
  0xd2   :  { %v71_v27 = vld [vmem:[#allocation10] sm:$0x1]  ;;  %s307_s3 = smov [#allocation7]   ;;  %s308_s8 = smov [#allocation10]  }
  0xd3   :  { %67 = vadd.xlane.f32.xlu1 %v66_v15  ;;  %v73_v18 = vadd.f32 %v72_v16, %v56_v14  ;;  %v83_v19 = vrot.slane %v82_v17, 2  ;;  %s95_s7 = sshll.u32 %s307_s3, 4  ;;  %s117_s9 = sshll.u32 %s308_s8, 4  ;;  %s96_s7 = int_to_ptr.vmem [resolvable:$true] %s95_s7  ;;  %s118_s9 = int_to_ptr.vmem [resolvable:$true] %s117_s9 }
  0xd4   :  { %s227_s10 = scalar_lea.vmem %s96_s7, 128  ;;  %p232_p11 = scmp.lt.s32.totalorder %s96_s7, %s96_s7 }
  0xd5   :  { %v74_v20 = vrot.slane %v73_v18, 2  ;;  %v84_v21 = vadd.f32 %v83_v19, %v82_v17  ;;  %p228_p10 = scmp.ne.s32.totalorder %s96_s7, %s227_s10  ;;  %p233_p12 = scmp.lt.s32.totalorder %s227_s10, %s227_s10 }
  0xd7   :  { %v75_v22 = vadd.f32 %v74_v20, %v73_v18  ;;  %v85_v23 = vrot.slane %v84_v21, 1  ;;  %p234_p13 = por %p233_p12, %p232_p11 }
  0xd9   :  { %v76_v25 = vrot.slane %v75_v22, 1  ;;  %v86_v26 = vadd.f32 %v85_v23, %v84_v21  ;;  %p235_p0 = pnand %p234_p13, %p228_p10 }
  0xdb   :  { %v77_v28 = vadd.f32 %v76_v25, %v75_v22  ;;  %v87_v29 = vadd.f32 %v86_v26, %v80_v24 }
  0xdd   :  { %v78_v30 = vadd.f32 %v77_v28, %v71_v27  ;;  %88 = vst [vmem:[#allocation11] sm:$0x1] %v87_v29 }
  0xdf   :  { %79 = vst [vmem:[#allocation10] sm:$0x1] %v78_v30 }
  0xe0   :  { %238 = shalt.err (!%p235_p0)
}
  0xe1   :  { %s239_s13 = scalar_lea.hbm %s422_s2, 128 }
  0xe2   :  { %p240_p1 = scmp.ne.s32.totalorder %s422_s2, %s239_s13  ;;  %p243_p2 = scmp.lt.u32.totalorder %s239_s13, %s422_s2 }
  0xe4   :  { %p245_p3 = pnand %p243_p2, %p240_p1 }
  0xe6   :  { %248 = shalt.err (!%p245_p3)
}
  0xe7   :  { %98 = dma.vmem_to_hbm [thread:$0]  %s96_s7, 128, %s422_s2, [#allocation4]  }
  0xe8   :  { %s249_s19 = scalar_lea.vmem %s118_s9, 16  ;;  %s253_s1 = scalar_lea.vmem %s118_s9, 32 }
  0xe9   :  { %p250_p4 = scmp.ne.s32.totalorder %s118_s9, %s249_s19  ;;  %p254_p5 = scmp.lt.s32.totalorder %s118_s9, %s118_s9 }
  0xea   :  { %p255_p6 = scmp.lt.s32.totalorder %s253_s1, %s249_s19 }
  0xec   :  { %p256_p7 = por %p255_p6, %p254_p5 }
  0xee   :  { %p257_p8 = pnand %p256_p7, %p250_p4 }
  0xf0   :  { %260 = shalt.err (!%p257_p8)
}
  0xf1   :  { %s261_s22 = scalar_lea.hbm %s425_s5, 16 }
  0xf2   :  { %p262_p9 = scmp.ne.s32.totalorder %s425_s5, %s261_s22  ;;  %p265_p10 = scmp.lt.u32.totalorder %s261_s22, %s425_s5 }
  0xf4   :  { %p267_p11 = pnand %p265_p10, %p262_p9 }
  0xf6   :  { %270 = shalt.err (!%p267_p11)
}
  0xf7   :  { %120 = dma.vmem_to_hbm [thread:$0]  %s118_s9, 16, %s425_s5, [#allocation9]  }
  0xf8   :  { %s309_s28 = smov [#allocation11]  }
  0xf9   :  { %s127_s29 = sshll.u32 %s309_s28, 4  ;;  %s128_s29 = int_to_ptr.vmem [resolvable:$true] %s127_s29 }
  0xfa   :  { %s271_s30 = scalar_lea.vmem %s128_s29, 16  ;;  %s275_s3 = scalar_lea.vmem %s128_s29, 32 }
  0xfb   :  { %p272_p12 = scmp.ne.s32.totalorder %s128_s29, %s271_s30  ;;  %p276_p13 = scmp.lt.s32.totalorder %s128_s29, %s128_s29 }
  0xfc   :  { %p277_p0 = scmp.lt.s32.totalorder %s275_s3, %s271_s30 }
  0xfe   :  { %p278_p1 = por %p277_p0, %p276_p13 }
 0x100   :  { %p279_p2 = pnand %p278_p1, %p272_p12 }
 0x102   :  { %282 = shalt.err (!%p279_p2)
}
 0x103   :  { %s283_s10 = scalar_lea.hbm %s426_s6, 16 }
 0x104   :  { %p284_p3 = scmp.ne.s32.totalorder %s426_s6, %s283_s10  ;;  %p287_p4 = scmp.lt.u32.totalorder %s283_s10, %s426_s6 }
 0x106   :  { %p289_p5 = pnand %p287_p4, %p284_p3 }
 0x108   :  { %292 = shalt.err (!%p289_p5)
}
 0x109   :  { %130 = dma.vmem_to_hbm [thread:$0]  %s128_s29, 16, %s426_s6, [#allocation12]   ;;  %vm69_vm0 = vcmask 7168  }
 0x160   :  { %v68_v31 = vpop.xlane.xlu1 %67 }
 0x161   :  { %70 = vst.msk [vmem:[%s424_s4] sm:$0xff] %vm69_vm0, %v68_v31 }
 0x162   :  { %297 = dma.done.wait [#allocation4], 128  }
 0x163   :  { %298 = vsyncadd [#allocation4], 4294967168 }
 0x164   :  { %299 = dma.done.wait [#allocation9], 144  }
 0x165   :  { %300 = vsyncadd [#allocation9], 4294967152 }
 0x166   :  { %301 = dma.done.wait [#allocation12], 16  }
 0x167   :  { %302 = vsyncadd [#allocation12], 4294967280 }
 0x168   :  { %145 = vsyncpa [#allocation3], 1 }
 0x169   :  { %146 = vsyncpa [#allocation6], 1 }
 0x16a   :  { %147 = vsyncpa [#allocation4], 1 }
 0x16b   :  { %148 = vsyncpa [#allocation9], 1 }
 0x16c   :  { %149 = vsyncpa [#allocation12], 1 }

</bundles_post_ra>
